<compile_context>
chip_gen: v7x
topology: tpu7x:2x2x1
jax: 0.10.0
libtpu: 0.0.40
codegen_flags: <defaults>
</compile_context>

<pallas_src>
import functools
import math

import jax
import jax.numpy as jnp
from jax.experimental import pallas as pl
from jax.experimental.pallas import tpu as pltpu

SELU_ALPHA = 1.6732632423543772
SELU_SCALE = 1.0507009873554805

_LANES = 128
_K_ALIGN = 16          # bf16 sublane packing granule -> keeps all row offsets tile-aligned


def _round_up(n, m):
    return ((n + m - 1) // m) * m


def _mlp_kernel(x_ref, w_ref, e_ref, o_ref, *, out_features, layout):
    (r1, k1, r2, k2, r3, k3, r4, k4, rv1, kv1) = layout

    x = x_ref[...].astype(jnp.bfloat16)                 # (Bb, k1) bf16 for MXU

    # f32 extras: biases, value-head row vector, value bias
    b1 = e_ref[0:1, :]
    b2 = e_ref[1:2, :]
    b3 = e_ref[2:3, :]
    b4 = e_ref[3:4, :]
    bv1 = e_ref[4:5, :]
    wv2_row = e_ref[5:6, :]
    bv2 = e_ref[6:7, 0:1]                               # (1, 1)

    def matmul(a_bf16, row, k):
        # bf16 x bf16 -> f32 accumulation on the MXU
        return jnp.dot(a_bf16, w_ref[row:row + k, :],
                       preferred_element_type=jnp.float32)

    # ---- policy head: (Linear -> ReLU) x3 -> [Dropout = id] -> Linear -> ReLU -> Softmax
    h = jnp.maximum(matmul(x, r1, k1) + b1, 0.0)                                  # (Bb,128)
    h = jnp.maximum(matmul(h[:, :k2].astype(jnp.bfloat16), r2, k2) + b2, 0.0)
    h = jnp.maximum(matmul(h[:, :k3].astype(jnp.bfloat16), r3, k3) + b3, 0.0)
    logits = jnp.maximum(matmul(h[:, :k4].astype(jnp.bfloat16), r4, k4) + b4, 0.0)

    # softmax over the logical OUT_F lanes only (padding lanes masked out)
    lane = jax.lax.broadcasted_iota(jnp.int32, logits.shape, 1)
    masked = jnp.where(lane < out_features, logits, jnp.float32(-1e30))
    m = jnp.max(masked, axis=-1, keepdims=True)
    e = jnp.exp(masked - m)                              # padding lanes -> 0
    denom = jnp.sum(e, axis=-1, keepdims=True)
    inv = pl.reciprocal(denom, approx=True)              # EUP slot
    inv = inv * (2.0 - denom * inv)                      # one Newton step -> normalized probs
    probs = e * inv

    # ---- value head: SELU(Linear(in,128)) -> Linear(128,1) as a lane reduce
    v = matmul(x, rv1, kv1) + bv1                        # (Bb,128) f32
    v = SELU_SCALE * jnp.where(
        v > 0.0, v, SELU_ALPHA * (jnp.exp(jnp.minimum(v, 0.0)) - 1.0))
    value = jnp.sum(v * wv2_row, axis=-1, keepdims=True) + bv2   # (Bb,1)

    # combined lane-dense output: probs in lanes [0:OUT_F), value in lane OUT_F
    o_ref[...] = probs + jnp.where(lane == out_features, value, 0.0)


def pack_params(params):
    """Pack weights into a compact bf16 slab + a small f32 extras tile.

    Weights are stored (in_features, out_features); each tile occupies only
    round_up(in_features, 16) rows (zero-padded), so all row offsets are
    aligned to the bf16 (16,128) tiling and every matmul is tile-aligned.
    """
    f_in, l1 = params["w1"].shape
    _, l2 = params["w2"].shape
    _, l3 = params["w3"].shape
    _, out_f = params["w4"].shape
    assert params["wv1"].shape == (f_in, 128) and params["wv2"].shape == (128, 1)
    assert max(f_in, l1, l2, l3) <= _LANES and out_f + 1 <= _LANES

    k1 = _round_up(f_in, _K_ALIGN)
    k2 = _round_up(l1, _K_ALIGN)
    k3 = _round_up(l2, _K_ALIGN)
    k4 = _round_up(l3, _K_ALIGN)
    kv1 = k1
    r1 = 0
    r2 = r1 + k1
    r3 = r2 + k2
    r4 = r3 + k3
    rv1 = r4 + k4
    n_rows = rv1 + kv1                                   # multiple of 16

    w = jnp.zeros((n_rows, _LANES), jnp.float32)
    w = w.at[r1:r1 + f_in, :l1].set(params["w1"])
    w = w.at[r2:r2 + l1, :l2].set(params["w2"])
    w = w.at[r3:r3 + l2, :l3].set(params["w3"])
    w = w.at[r4:r4 + l3, :out_f].set(params["w4"])
    w = w.at[rv1:rv1 + f_in, :128].set(params["wv1"])
    w_slab = w.astype(jnp.bfloat16)                      # halves the dominant DMA

    extras = jnp.zeros((8, _LANES), jnp.float32)
    extras = extras.at[0, :l1].set(params["b1"].reshape(-1))
    extras = extras.at[1, :l2].set(params["b2"].reshape(-1))
    extras = extras.at[2, :l3].set(params["b3"].reshape(-1))
    extras = extras.at[3, :out_f].set(params["b4"].reshape(-1))
    extras = extras.at[4, :128].set(params["bv1"].reshape(-1))
    extras = extras.at[5, :128].set(params["wv2"].reshape(-1))
    extras = extras.at[6, 0].set(params["bv2"].reshape(()))

    layout = (r1, k1, r2, k2, r3, k3, r4, k4, rv1, kv1)
    return w_slab, extras, layout, out_f


def mymodel_forward(x, w_slab, extras, out_features, layout):
    B, f_in = x.shape
    k1 = layout[1]
    assert f_in <= k1 and out_features + 1 <= _LANES

    # pad batch to full sublanes; for large B use 256-row blocks so per-step
    # grid overhead is amortized and v7x can still shard across both TCs.
    if B <= 256:
        b_pad = _round_up(max(B, 1), 8)
        block_b = b_pad
    else:
        block_b = 256
        b_pad = _round_up(B, block_b)

    # pad lanes only to k1 (=16), not 128
    x_pad = jnp.zeros((b_pad, k1), jnp.float32).at[:B, :f_in].set(
        x.astype(jnp.float32))

    n_rows = w_slab.shape[0]
    grid = (b_pad // block_b,)
    out = pl.pallas_call(
        functools.partial(_mlp_kernel, out_features=out_features, layout=layout),
        out_shape=jax.ShapeDtypeStruct((b_pad, _LANES), jnp.float32),
        grid=grid,
        in_specs=[
            pl.BlockSpec((block_b, k1), lambda i: (i, 0)),
            pl.BlockSpec((n_rows, _LANES), lambda i: (0, 0)),   # constant index -> fetched once
            pl.BlockSpec((8, _LANES), lambda i: (0, 0)),
        ],
        out_specs=pl.BlockSpec((block_b, _LANES), lambda i: (i, 0)),
        compiler_params=pltpu.CompilerParams(
            dimension_semantics=("parallel",)),
    )(x_pad, w_slab, extras)

    action = out[:B, :out_features]
    value = out[:B, out_features:out_features + 1]
    return action, value


def init_params(key, input_features, output_features, layers=(64, 32, 16)):
    """Deterministic init mirroring torch.nn.Linear default (uniform +-1/sqrt(fan_in)).
    Weights stored as (in_features, out_features)."""
    params = {}

    def linear(key, fan_in, fan_out):
        kw, kb = jax.random.split(key)
        bound = 1.0 / math.sqrt(fan_in)
        w = jax.random.uniform(kw, (fan_in, fan_out), jnp.float32, -bound, bound)
        b = jax.random.uniform(kb, (1, fan_out), jnp.float32, -bound, bound)
        return w, b

    keys = jax.random.split(key, 6)
    dims = [input_features] + list(layers)
    for i in range(3):
        w, b = linear(keys[i], dims[i], dims[i + 1])
        params[f"w{i+1}"], params[f"b{i+1}"] = w, b
    params["w4"], params["b4"] = linear(keys[3], dims[-1], output_features)
    params["wv1"], params["bv1"] = linear(keys[4], input_features, 128)
    params["wv2"], params["bv2"] = linear(keys[5], 128, 1)
    return params


def _reference_forward(x, p):
    """Pure-f32 reference (original module semantics)."""
    h = jnp.maximum(x @ p["w1"] + p["b1"], 0.0)
    h = jnp.maximum(h @ p["w2"] + p["b2"], 0.0)
    h = jnp.maximum(h @ p["w3"] + p["b3"], 0.0)
    logits = jnp.maximum(h @ p["w4"] + p["b4"], 0.0)
    action = jax.nn.softmax(logits, axis=-1)
    v = jax.nn.selu(x @ p["wv1"] + p["bv1"])
    value = v @ p["wv2"] + p["bv2"]
    return action, value


def _bf16_reference_forward(x, p):
    """Reference with the same bf16 weight / activation quantization the kernel uses
    (biases, wv2, bv2 and all accumulation / elementwise math stay f32)."""
    bf = jnp.bfloat16

    def mm(a, w):
        return jnp.dot(a.astype(bf), w.astype(bf),
                       preferred_element_type=jnp.float32)

    h = jnp.maximum(mm(x, p["w1"]) + p["b1"], 0.0)
    h = jnp.maximum(mm(h, p["w2"]) + p["b2"], 0.0)
    h = jnp.maximum(mm(h, p["w3"]) + p["b3"], 0.0)
    logits = jnp.maximum(mm(h, p["w4"]) + p["b4"], 0.0)
    m = jnp.max(logits, axis=-1, keepdims=True)
    e = jnp.exp(logits - m)
    action = e / jnp.sum(e, axis=-1, keepdims=True)
    v = jax.nn.selu(mm(x, p["wv1"]) + p["bv1"])
    value = v @ p["wv2"] + p["bv2"]
    return action, value


if __name__ == "__main__":
    # Acrobot-like sizes: 6 observation features, 3 discrete actions.
    IN_F, OUT_F = 6, 3
    key = jax.random.PRNGKey(0)
    k_x, k_x2, k_p = jax.random.split(key, 3)
    params = init_params(k_p, IN_F, OUT_F)

    # pack once (amortized across calls)
    w_slab, extras, layout, out_f = pack_params(params)
    assert out_f == OUT_F

    fwd = jax.jit(mymodel_forward, static_argnums=(3, 4))

    tests = (
        ("small", jax.random.normal(k_x, (8, IN_F), dtype=jnp.float32)),
        ("large", jax.random.normal(k_x2, (300, IN_F), dtype=jnp.float32)),
    )
    for name, xb in tests:
        action, value = fwd(xb, w_slab, extras, OUT_F, layout)
        action = jax.block_until_ready(action)
        value = jax.block_until_ready(value)
        B = xb.shape[0]
        assert action.shape == (B, OUT_F) and value.shape == (B, 1)

        # tight check against a reference using the same bf16 quantization
        qa, qv = _bf16_reference_forward(xb, params)
        assert jnp.allclose(action, qa, atol=1e-3, rtol=1e-3), name
        assert jnp.allclose(value, qv, atol=1e-3, rtol=1e-3), name

        # loose sanity check against the pure-f32 module semantics
        # (difference is dominated by bf16 weight storage)
        ra, rv = _reference_forward(xb, params)
        assert jnp.allclose(action, ra, atol=1e-2, rtol=1e-2), name
        assert jnp.allclose(value, rv, atol=1e-2, rtol=1e-2), name

        # Newton-refined reciprocal keeps the distribution normalized
        assert jnp.allclose(jnp.sum(action, axis=-1), 1.0, atol=1e-4), name

    print("KERNEL_OK")
</pallas_src>

<mosaic_0001>
module attributes {stable_mosaic.version = 11 : i64} {
  func.func @_mlp_kernel(%arg0: i32, %arg1: memref<8x16xf32, #tpu.memory_space<vmem>>, %arg2: memref<144x128xbf16, #tpu.memory_space<vmem>>, %arg3: memref<8x128xf32, #tpu.memory_space<vmem>>, %arg4: memref<8x128xf32, #tpu.memory_space<vmem>>) attributes {dimension_semantics = [#tpu.dimension_semantics<parallel>], iteration_bounds = array<i64: 1>, scalar_prefetch = 0 : i64, scratch_operands = 0 : i64, tpu.core_type = #tpu.core_type<tc>, window_params = [{transform_indices = @transform_0, window_bounds = array<i64: 8, 16>}, {pipeline_mode = #tpu.pipeline_mode<synchronous>, transform_indices = @transform_1, window_bounds = array<i64: 144, 128>}, {pipeline_mode = #tpu.pipeline_mode<synchronous>, transform_indices = @transform_2, window_bounds = array<i64: 8, 128>}, {transform_indices = @transform_3, window_bounds = array<i64: 8, 128>}]} {
    %c0 = arith.constant 0 : index
    %c0_0 = arith.constant 0 : index
    %0 = vector.load %arg1[%c0, %c0_0] : memref<8x16xf32, #tpu.memory_space<vmem>>, vector<8x16xf32>
    %1 = arith.truncf %0 : vector<8x16xf32> to vector<8x16xbf16>
    %c0_1 = arith.constant 0 : index
    %c0_2 = arith.constant 0 : index
    %2 = vector.load %arg3[%c0_1, %c0_2] : memref<8x128xf32, #tpu.memory_space<vmem>>, vector<1x128xf32>
    %c1 = arith.constant 1 : index
    %c0_3 = arith.constant 0 : index
    %3 = vector.load %arg3[%c1, %c0_3] : memref<8x128xf32, #tpu.memory_space<vmem>>, vector<1x128xf32>
    %c2 = arith.constant 2 : index
    %c0_4 = arith.constant 0 : index
    %4 = vector.load %arg3[%c2, %c0_4] : memref<8x128xf32, #tpu.memory_space<vmem>>, vector<1x128xf32>
    %c3 = arith.constant 3 : index
    %c0_5 = arith.constant 0 : index
    %5 = vector.load %arg3[%c3, %c0_5] : memref<8x128xf32, #tpu.memory_space<vmem>>, vector<1x128xf32>
    %c4 = arith.constant 4 : index
    %c0_6 = arith.constant 0 : index
    %6 = vector.load %arg3[%c4, %c0_6] : memref<8x128xf32, #tpu.memory_space<vmem>>, vector<1x128xf32>
    %c5 = arith.constant 5 : index
    %c0_7 = arith.constant 0 : index
    %7 = vector.load %arg3[%c5, %c0_7] : memref<8x128xf32, #tpu.memory_space<vmem>>, vector<1x128xf32>
    %c6 = arith.constant 6 : index
    %c0_8 = arith.constant 0 : index
    %8 = vector.load %arg3[%c6, %c0_8] : memref<8x128xf32, #tpu.memory_space<vmem>>, vector<1x1xf32>
    %c0_9 = arith.constant 0 : index
    %c0_10 = arith.constant 0 : index
    %9 = vector.load %arg2[%c0_9, %c0_10] : memref<144x128xbf16, #tpu.memory_space<vmem>>, vector<16x128xbf16>
    %cst = arith.constant dense<0.000000e+00> : vector<8x128xf32>
    %10 = tpu.matmul %1, %9, %cst {dimension_numbers = #tpu.dot_dimension_numbers<[1], [0], [0], [1], [0, 0, 1, 1], [], []>} : vector<8x16xbf16>, vector<16x128xbf16>, vector<8x128xf32> -> vector<8x128xf32>
    %11 = vector.broadcast %2 : vector<1x128xf32> to vector<8x128xf32>
    %12 = arith.addf %10, %11 : vector<8x128xf32>
    %cst_11 = arith.constant 0.000000e+00 : f32
    %13 = vector.broadcast %cst_11 : f32 to vector<8x128xf32>
    %14 = arith.maximumf %12, %13 : vector<8x128xf32>
    %15 = vector.extract_strided_slice %14 {offsets = [0, 0], sizes = [8, 64], strides = [1, 1]} : vector<8x128xf32> to vector<8x64xf32>
    %16 = arith.truncf %15 : vector<8x64xf32> to vector<8x64xbf16>
    %c16 = arith.constant 16 : index
    %c0_12 = arith.constant 0 : index
    %17 = vector.load %arg2[%c16, %c0_12] : memref<144x128xbf16, #tpu.memory_space<vmem>>, vector<64x128xbf16>
    %cst_13 = arith.constant dense<0.000000e+00> : vector<8x128xf32>
    %18 = tpu.matmul %16, %17, %cst_13 {dimension_numbers = #tpu.dot_dimension_numbers<[1], [0], [0], [1], [0, 0, 1, 1], [], []>} : vector<8x64xbf16>, vector<64x128xbf16>, vector<8x128xf32> -> vector<8x128xf32>
    %19 = vector.broadcast %3 : vector<1x128xf32> to vector<8x128xf32>
    %20 = arith.addf %18, %19 : vector<8x128xf32>
    %cst_14 = arith.constant 0.000000e+00 : f32
    %21 = vector.broadcast %cst_14 : f32 to vector<8x128xf32>
    %22 = arith.maximumf %20, %21 : vector<8x128xf32>
    %23 = vector.extract_strided_slice %22 {offsets = [0, 0], sizes = [8, 32], strides = [1, 1]} : vector<8x128xf32> to vector<8x32xf32>
    %24 = arith.truncf %23 : vector<8x32xf32> to vector<8x32xbf16>
    %c80 = arith.constant 80 : index
    %c0_15 = arith.constant 0 : index
    %25 = vector.load %arg2[%c80, %c0_15] : memref<144x128xbf16, #tpu.memory_space<vmem>>, vector<32x128xbf16>
    %cst_16 = arith.constant dense<0.000000e+00> : vector<8x128xf32>
    %26 = tpu.matmul %24, %25, %cst_16 {dimension_numbers = #tpu.dot_dimension_numbers<[1], [0], [0], [1], [0, 0, 1, 1], [], []>} : vector<8x32xbf16>, vector<32x128xbf16>, vector<8x128xf32> -> vector<8x128xf32>
    %27 = vector.broadcast %4 : vector<1x128xf32> to vector<8x128xf32>
    %28 = arith.addf %26, %27 : vector<8x128xf32>
    %cst_17 = arith.constant 0.000000e+00 : f32
    %29 = vector.broadcast %cst_17 : f32 to vector<8x128xf32>
    %30 = arith.maximumf %28, %29 : vector<8x128xf32>
    %31 = vector.extract_strided_slice %30 {offsets = [0, 0], sizes = [8, 16], strides = [1, 1]} : vector<8x128xf32> to vector<8x16xf32>
    %32 = arith.truncf %31 : vector<8x16xf32> to vector<8x16xbf16>
    %c112 = arith.constant 112 : index
    %c0_18 = arith.constant 0 : index
    %33 = vector.load %arg2[%c112, %c0_18] : memref<144x128xbf16, #tpu.memory_space<vmem>>, vector<16x128xbf16>
    %cst_19 = arith.constant dense<0.000000e+00> : vector<8x128xf32>
    %34 = tpu.matmul %32, %33, %cst_19 {dimension_numbers = #tpu.dot_dimension_numbers<[1], [0], [0], [1], [0, 0, 1, 1], [], []>} : vector<8x16xbf16>, vector<16x128xbf16>, vector<8x128xf32> -> vector<8x128xf32>
    %35 = vector.broadcast %5 : vector<1x128xf32> to vector<8x128xf32>
    %36 = arith.addf %34, %35 : vector<8x128xf32>
    %cst_20 = arith.constant 0.000000e+00 : f32
    %37 = vector.broadcast %cst_20 : f32 to vector<8x128xf32>
    %38 = arith.maximumf %36, %37 : vector<8x128xf32>
    %39 = tpu.iota {dimensions = array<i32: 1>} : vector<8x128xi32>
    %c3_i32 = arith.constant 3 : i32
    %40 = vector.broadcast %c3_i32 : i32 to vector<8x128xi32>
    %41 = arith.cmpi slt, %39, %40 : vector<8x128xi32>
    %cst_21 = arith.constant -1.000000e+30 : f32
    %42 = vector.broadcast %cst_21 : f32 to vector<8x128xf32>
    %43 = arith.select %41, %38, %42 : vector<8x128xi1>, vector<8x128xf32>
    %cst_22 = arith.constant dense<0xFF800000> : vector<8xf32>
    %44 = vector.multi_reduction <maximumf>, %43, %cst_22 [1] : vector<8x128xf32> to vector<8xf32>
    %45 = vector.shape_cast %44 : vector<8xf32> to vector<8x1xf32>
    %46 = vector.broadcast %45 : vector<8x1xf32> to vector<8x128xf32>
    %47 = arith.subf %43, %46 : vector<8x128xf32>
    %48 = math.exp %47 : vector<8x128xf32>
    %cst_23 = arith.constant dense<0.000000e+00> : vector<8xf32>
    %49 = vector.multi_reduction <add>, %48, %cst_23 [1] : vector<8x128xf32> to vector<8xf32>
    %50 = vector.shape_cast %49 : vector<8xf32> to vector<8x1xf32>
    %51 = tpu.reciprocal %50 {approx = true} : vector<8x1xf32> -> vector<8x1xf32>
    %52 = arith.mulf %50, %51 : vector<8x1xf32>
    %cst_24 = arith.constant 2.000000e+00 : f32
    %53 = vector.broadcast %cst_24 : f32 to vector<8x1xf32>
    %54 = arith.subf %53, %52 : vector<8x1xf32>
    %55 = arith.mulf %51, %54 : vector<8x1xf32>
    %56 = vector.broadcast %55 : vector<8x1xf32> to vector<8x128xf32>
    %57 = arith.mulf %48, %56 : vector<8x128xf32>
    %c128 = arith.constant 128 : index
    %c0_25 = arith.constant 0 : index
    %58 = vector.load %arg2[%c128, %c0_25] : memref<144x128xbf16, #tpu.memory_space<vmem>>, vector<16x128xbf16>
    %cst_26 = arith.constant dense<0.000000e+00> : vector<8x128xf32>
    %59 = tpu.matmul %1, %58, %cst_26 {dimension_numbers = #tpu.dot_dimension_numbers<[1], [0], [0], [1], [0, 0, 1, 1], [], []>} : vector<8x16xbf16>, vector<16x128xbf16>, vector<8x128xf32> -> vector<8x128xf32>
    %60 = vector.broadcast %6 : vector<1x128xf32> to vector<8x128xf32>
    %61 = arith.addf %59, %60 : vector<8x128xf32>
    %cst_27 = arith.constant 0.000000e+00 : f32
    %62 = vector.broadcast %cst_27 : f32 to vector<8x128xf32>
    %63 = arith.cmpf ogt, %61, %62 : vector<8x128xf32>
    %cst_28 = arith.constant 0.000000e+00 : f32
    %64 = vector.broadcast %cst_28 : f32 to vector<8x128xf32>
    %65 = arith.minimumf %61, %64 : vector<8x128xf32>
    %66 = math.exp %65 : vector<8x128xf32>
    %cst_29 = arith.constant 1.000000e+00 : f32
    %67 = vector.broadcast %cst_29 : f32 to vector<8x128xf32>
    %68 = arith.subf %66, %67 : vector<8x128xf32>
    %cst_30 = arith.constant 1.67326319 : f32
    %69 = vector.broadcast %cst_30 : f32 to vector<8x128xf32>
    %70 = arith.mulf %69, %68 : vector<8x128xf32>
    %71 = arith.select %63, %61, %70 : vector<8x128xi1>, vector<8x128xf32>
    %cst_31 = arith.constant 1.05070102 : f32
    %72 = vector.broadcast %cst_31 : f32 to vector<8x128xf32>
    %73 = arith.mulf %72, %71 : vector<8x128xf32>
    %74 = vector.broadcast %7 : vector<1x128xf32> to vector<8x128xf32>
    %75 = arith.mulf %73, %74 : vector<8x128xf32>
    %cst_32 = arith.constant dense<0.000000e+00> : vector<8xf32>
    %76 = vector.multi_reduction <add>, %75, %cst_32 [1] : vector<8x128xf32> to vector<8xf32>
    %77 = vector.shape_cast %76 : vector<8xf32> to vector<8x1xf32>
    %78 = vector.broadcast %8 : vector<1x1xf32> to vector<8x1xf32>
    %79 = arith.addf %77, %78 : vector<8x1xf32>
    %c3_i32_33 = arith.constant 3 : i32
    %80 = vector.broadcast %c3_i32_33 : i32 to vector<8x128xi32>
    %81 = arith.cmpi eq, %39, %80 : vector<8x128xi32>
    %cst_34 = arith.constant 0.000000e+00 : f32
    %82 = vector.shape_cast %79 : vector<8x1xf32> to vector<8x1xf32>
    %83 = vector.broadcast %82 : vector<8x1xf32> to vector<8x128xf32>
    %84 = vector.broadcast %cst_34 : f32 to vector<8x128xf32>
    %85 = arith.select %81, %83, %84 : vector<8x128xi1>, vector<8x128xf32>
    %86 = arith.addf %57, %85 : vector<8x128xf32>
    %c0_35 = arith.constant 0 : index
    %c0_36 = arith.constant 0 : index
    %87 = vector.load %arg4[%c0_35, %c0_36] : memref<8x128xf32, #tpu.memory_space<vmem>>, vector<8x128xf32>
    tpu.vector_store %arg4[%c0_35, %c0_36], %86 {strides = array<i32>} : memref<8x128xf32, #tpu.memory_space<vmem>>, vector<8x128xf32>,
    return
  }
  func.func @transform_0(%arg0: i32) -> (i32, i32) {
    %c0_i32 = arith.constant 0 : i32
    %c0_i32_0 = arith.constant 0 : i32
    return %arg0, %c0_i32 : i32, i32
  }
  func.func @transform_1(%arg0: i32) -> (i32, i32) {
    %c0_i32 = arith.constant 0 : i32
    %c0_i32_0 = arith.constant 0 : i32
    %c0_i32_1 = arith.constant 0 : i32
    return %c0_i32, %c0_i32_0 : i32, i32
  }
  func.func @transform_2(%arg0: i32) -> (i32, i32) {
    %c0_i32 = arith.constant 0 : i32
    %c0_i32_0 = arith.constant 0 : i32
    %c0_i32_1 = arith.constant 0 : i32
    return %c0_i32, %c0_i32_0 : i32, i32
  }
  func.func @transform_3(%arg0: i32) -> (i32, i32) {
    %c0_i32 = arith.constant 0 : i32
    %c0_i32_0 = arith.constant 0 : i32
    return %arg0, %c0_i32 : i32, i32
  }
}

</mosaic_0001>

<bundles_post_ra>
// kernel: mymodel_forward.1
= control target key start
LH: loop header
LB: loop body
LE: loop exit
PB: predicated region body
PF: predicated region fallthrough
CT: control target
= control target key end

     0   :  { %8 = vsyncpa [#allocation3], 0  ;;  %s523_s12 = smov [#allocation2]   ;;  %s596_s0 = inlined_call_operand.vmem [shape: f32[8,16], index: 0, kind: input, shape index: {}]   ;;  %s597_s1 = inlined_call_operand.hbm [shape: bf16[144,128], index: 1, kind: input, shape index: {}]   ;;  %s598_s2 = inlined_call_operand.vmem [shape: f32[8,128], index: 2, kind: input, shape index: {}]   ;;  %s599_s3 = inlined_call_operand.vmem [shape: f32[8,128], index: 3, kind: output, shape index: {}]  }
   0x1   :  { %s16_s13 = sshll.u32 %s523_s12, 4  ;;  %s499_s16 = scalar_lea.hbm %s597_s1, 1152  ;;  %s17_s13 = int_to_ptr.vmem [resolvable:$true] %s16_s13 }
   0x2   :  { %p500_p0 = scmp.ne.s32.totalorder %s597_s1, %s499_s16  ;;  %p503_p1 = scmp.lt.u32.totalorder %s499_s16, %s597_s1 }
   0x4   :  { %p505_p2 = pnand %p503_p1, %p500_p0 }
   0x6   :  { %508 = shalt.err (!%p505_p2)
}
   0x7   :  { %s509_s21 = scalar_lea.vmem %s17_s13, 1152  ;;  %p514_p4 = scmp.lt.s32.totalorder %s17_s13, %s17_s13 }
   0x8   :  { %p510_p3 = scmp.ne.s32.totalorder %s17_s13, %s509_s21  ;;  %p515_p5 = scmp.lt.s32.totalorder %s509_s21, %s509_s21 }
   0xa   :  { %p516_p6 = por %p515_p5, %p514_p4 }
   0xc   :  { %p517_p7 = pnand %p516_p6, %p510_p3 }
   0xe   :  { %520 = shalt.err (!%p517_p7)
}
   0xf   :  { %s524_s22 = smov 64   ;;  %s525_s23 = smov 4  }
  0x10   :  { %22 = dma.hbm_to_vmem [thread:$0]  %s597_s1, 1152, %s17_s13, [#allocation3], %s524_s22, %s524_s22, %s525_s23  }
  0x11   :  { %521 = dma.done.wait [#allocation3], 1152  }
  0x12   :  { %522 = vsyncadd [#allocation3], 4294966144  ;;  %v526_v0 = vmov 0.0   ;;  %vm527_vm0 = vmmov 0   ;;  %v484_v1 = vld [vmem:[#allocation2] sm:$0xff]   ;;  %vm50_vm1 = vcmask 130048   ;;  %v300_v46 = vlaneseq }
  0x13   :  { %438 = vmatprep.subr.bf16.mxu0 %v526_v0  ;;  %440 = vmatprep.mubr.msk.bf16.mxu0 %vm527_vm0, %v526_v0  ;;  %v29_v2 = vld [vmem:[%s596_s0] sm:$0xff]  ;;  %v485_v4 = vld [vmem:[#allocation2 + $0x8] sm:$0xff]   ;;  %v486_v5 = vld [vmem:[#allocation2 + $0x10] sm:$0xff]   ;;  %vm132_vm2 = vcmask 523264   ;;  %vm198_vm3 = vcmask 261120   ;;  %v528_v61 = vmov 0  }
  0x14   :  { %444 = vmatprep.subr.bf16.mxu1 %v526_v0  ;;  %452 = vmatprep.mubr.msk.bf16.mxu1 %vm527_vm0, %v526_v0  ;;  %v30_v3 = vpack.c.bf16 %v29_v2, %v29_v2  ;;  %v487_v6 = vld [vmem:[#allocation2 + $0x18] sm:$0xff]   ;;  %v488_v7 = vld [vmem:[#allocation2 + $0x20] sm:$0xff]   ;;  %v489_v8 = vld [vmem:[#allocation2 + $0x28] sm:$0xff]   ;;  %v301_v49 = vand.u32 127, %v300_v46 }
  0x15   :  { %439 = vmatpush3.bf16.msra.mxu0 %v484_v1  ;;  %445 = vmatpush3.bf16.msra.mxu1 %v485_v4  ;;  %v402_v9 = vld [vmem:[%s598_s2] ss:$0 sm:$0xff]  ;;  %v490_v17 = vld [vmem:[#allocation2 + $0x30] sm:$0xff]   ;;  %v405_v18 = vld [vmem:[%s598_s2 + $0x1] ss:$0 sm:$0xff] }
  0x16   :  { %456 = vmatprep.subr.bf16.mxu0 %v526_v0  ;;  %446 = vmatprep.subr.bf16.mxu1 %v526_v0  ;;  %v491_v25 = vld [vmem:[#allocation2 + $0x38] sm:$0xff]   ;;  %v492_v27 = vld [vmem:[#allocation2 + $0x40] sm:$0xff]   ;;  %vm302_vm5 = vcmp.lt.s32.totalorder %v301_v49, 3  ;;  %vm388_vm6 = vcmp.eq.s32.totalorder %v301_v49, 3 }
  0x17   :  { %v411_v28 = vld [vmem:[%s598_s2 + $0x2] ss:$0 sm:$0xff]  ;;  %v418_v40 = vld [vmem:[%s598_s2 + $0x4] ss:$0 sm:$0xff]  ;;  %v415_v48 = vld [vmem:[%s598_s2 + $0x3] ss:$0 sm:$0xff]  ;;  %482 = vset.pattern.permute.xlu1 %v528_v61  ;;  %483 = vset.pattern.permute.xlu0 %v528_v61 }
  0x18   :  { %441 = vmatmul.mubr.msk.bf16.vlgmr.msra.gmra.mrb[0].mxu0 %vm50_vm1, %v30_v3  ;;  %v422_v58 = vld [vmem:[%s598_s2 + $0x5] ss:$0 sm:$0xff]  ;;  %v423_v2 = vld [vmem:[%s598_s2 + $0x6] ss:$0 sm:$0xff] }
  0x19   :  { %460 = vmatprep.mubr.msk.bf16.mxu0 %vm527_vm0, %v526_v0  ;;  %447 = vmatpush3.bf16.msra.mxu1 %v486_v5 }
  0x1a   :  { %448 = vmatprep.subr.bf16.mxu1 %v526_v0  ;;  %457 = vmatpush3.bf16.msra.mxu0 %v489_v8 }
  0x1b   :  { %458 = vmatprep.subr.bf16.mxu0 %v526_v0 }
  0x1d   :  { %449 = vmatpush3.bf16.msra.mxu1 %v487_v6 }
  0x1e   :  { %450 = vmatprep.subr.bf16.mxu1 %v526_v0  ;;  %459 = vmatpush3.bf16.msra.mxu0 %v490_v17 }
  0x1f   :  { %464 = vmatprep.subr.bf16.mxu0 %v526_v0 }
  0x21   :  { %451 = vmatpush3.bf16.msra.mxu1 %v488_v7 }
  0x22   :  { %470 = vmatprep.subr.bf16.mxu1 %v526_v0 }
  0xeb   :  { %v88_v10 = vpop.f32.mrb[0].mxu0 }
  0xec   :  { %v89_v11 = vadd.f32 %v402_v9, %v88_v10  ;;  %v442_v12 = vpop.f32.mrb[1].mxu0 }
  0xed   :  { %v91_v13 = vpop.f32.mrb[2].mxu0 }
  0xee   :  { %v94_v14 = vmax.f32 %v89_v11, 0.0  ;;  %v443_v15 = vpop.f32.mrb[3].mxu0 }
  0xf0   :  { %v95_v16 = vpack.c.bf16 %v94_v14, %v94_v14 }
  0xf2   :  { %453 = vmatmul.mubr.msk.bf16.vlgmr.msra.gmra.mrb[0].mxu1 %vm132_vm2, %v95_v16 }
  0xf3   :  { %472 = vmatprep.mubr.msk.bf16.mxu1 %vm527_vm0, %v526_v0  ;;  %471 = vmatpush3.bf16.msra.mxu1 %v492_v27 }
  0xfa   :  { %473 = vmatmul.mubr.msk.bf16.vlgmr.msra.gmra.mrb[4].mxu1 %vm50_vm1, %v30_v3 }
 0x1c5   :  { %v170_v19 = vpop.f32.mrb[0].mxu1 }
 0x1c6   :  { %v171_v20 = vadd.f32 %v405_v18, %v170_v19  ;;  %v454_v21 = vpop.f32.mrb[1].mxu1 }
 0x1c7   :  { %v173_v22 = vpop.f32.mrb[2].mxu1 }
 0x1c8   :  { %v176_v23 = vmax.f32 %v171_v20, 0.0  ;;  %v455_v24 = vpop.f32.mrb[3].mxu1 }
 0x1ca   :  { %v177_v26 = vpack.c.bf16 %v176_v23, %v176_v23 }
 0x1cc   :  { %461 = vmatmul.mubr.msk.bf16.vlgmr.msra.gmra.mrb[4].mxu0 %vm198_vm3, %v177_v26 }
 0x1cd   :  { %465 = vmatpush3.bf16.msra.mxu0 %v491_v25  ;;  %466 = vmatprep.mubr.msk.bf16.mxu0 %vm527_vm0, %v526_v0  ;;  %v362_v36 = vpop.f32.mrb[4].mxu1 }
 0x1ce   :  { %v474_v37 = vpop.f32.mrb[5].mxu1  ;;  %v363_v41 = vadd.f32 %v418_v40, %v362_v36 }
 0x1cf   :  { %v365_v38 = vpop.f32.mrb[6].mxu1 }
 0x1d0   :  { %v475_v39 = vpop.f32.mrb[7].mxu1  ;;  %v369_v42 = vmin.f32 %v363_v41, 0.0  ;;  %vm368_vm4 = vcmp.gt.f32.partialorder %v363_v41, 0.0 }
 0x1d2   :  { %v370_v43 = vmul.f32 1.442695, %v369_v42 }
 0x1d4   :  { %493 = vpow2.f32 %v370_v43 }
 0x1de   :  { %v494_v44 = vpop.eup %493 }
 0x1df   :  { %v421_v45 = vadd.f32 -1.0, %v494_v44 }
 0x1e1   :  { %v373_v47 = vmul.f32 1.6732632, %v421_v45 }
 0x1e3   :  { %v374_v50 = vsel %vm368_vm4, %v363_v41, %v373_v47 }
 0x1e4   :  { %v375_v55 = vmul.f32 1.050701, %v374_v50 }
 0x1e6   :  { %v380_v60 = vmul.f32 %v422_v58, %v375_v55 }
 0x29f   :  { %v236_v29 = vpop.f32.mrb[4].mxu0 }
 0x2a0   :  { %v237_v30 = vadd.f32 %v411_v28, %v236_v29  ;;  %v462_v31 = vpop.f32.mrb[5].mxu0 }
 0x2a1   :  { %v239_v32 = vpop.f32.mrb[6].mxu0 }
 0x2a2   :  { %v242_v33 = vmax.f32 %v237_v30, 0.0  ;;  %v463_v34 = vpop.f32.mrb[7].mxu0 }
 0x2a4   :  { %v243_v35 = vpack.c.bf16 %v242_v33, %v242_v33 }
 0x2a6   :  { %467 = vmatmul.mubr.msk.bf16.vlgmr.msra.gmra.mrb[8].mxu0 %vm50_vm1, %v243_v35 }
 0x379   :  { %v293_v51 = vpop.f32.mrb[8].mxu0 }
 0x37a   :  { %v294_v52 = vadd.f32 %v415_v48, %v293_v51  ;;  %v468_v53 = vpop.f32.mrb[9].mxu0 }
 0x37b   :  { %v296_v54 = vpop.f32.mrb[10].mxu0 }
 0x37c   :  { %v299_v56 = vmax.f32 %v294_v52, 0.0  ;;  %v469_v57 = vpop.f32.mrb[11].mxu0 }
 0x37e   :  { %v303_v59 = vsel %vm302_vm5, %v299_v56, -1e+30 }
 0x37f   :  { %304 = vmax.xlane.f32.xlu0 %v303_v59 }
 0x383   :  { %381 = vadd.xlane.f32.xlu0 %v380_v60 }
 0x40c   :  { %v305_v62 = vpop.xlane.xlu0 %304 }
 0x40d   :  { %v306_v63 = vsub.f32 %v303_v59, %v305_v62 }
 0x40f   :  { %v307_v0 = vmul.f32 1.442695, %v306_v63 }
 0x410   :  { %v382_v3 = vpop.xlane.xlu0 %381 }
 0x411   :  { %495 = vpow2.f32 %v307_v0  ;;  %v387_v4 = vadd.f32 %v423_v2, %v382_v3 }
 0x41b   :  { %v496_v1 = vpop.eup %495 }
 0x41c   :  { %309 = vadd.xlane.f32.xlu1 %v496_v1 }
 0x42d   :  { %391 = vperm.xlu1 %482, %v387_v4  }
 0x4a9   :  { %v310_v5 = vpop.xlane.xlu1 %309 }
 0x4aa   :  { %497 = vrcp.f32 %v310_v5 }
 0x4ad   :  { %v392_v10 = vpop.permute.xlu1 %391 }
 0x4ae   :  { %v394_v12 = vsel %vm388_vm6, %v392_v10, 0.0 }
 0x4b4   :  { %v498_v6 = vpop.eup %497 }
 0x4b5   :  { %v312_v7 = vmul.f32 %v498_v6, %v310_v5 }
 0x4b7   :  { %v313_v8 = vsub.f32 2.0, %v312_v7 }
 0x4b9   :  { %v314_v9 = vmul.f32 %v498_v6, %v313_v8 }
 0x4bb   :  { %v315_v11 = vmul.f32 %v496_v1, %v314_v9 }
 0x4bd   :  { %v395_v13 = vadd.f32 %v394_v12, %v315_v11 }
 0x4bf   :  { %396 = vst [vmem:[%s599_s3] sm:$0xff] %v395_v13 }
 0x4c0   :  { %401 = vsyncpa [#allocation3], 1 }

</bundles_post_ra>
